<compile_context>
chip_gen: v6e
topology: v6e:2x2x1
jax: 0.10.0
libtpu: 0.0.40
codegen_flags: <defaults>
</compile_context>

<pallas_src>
import functools

import jax
import jax.numpy as jnp
from jax.experimental import pallas as pl
from jax.experimental.pallas import tpu as pltpu


def _round_up(x, m):
    return (x + m - 1) // m * m


# --------------------------- pass 1: conv + stats ----------------------------
def _conv_stats_kernel(p_ref, w_ref, y_ref, sum_ref, ssq_ref, acc_ref):
    # p_ref:   (TM, TK)      bf16
    # w_ref:   (TK, Coutp)   bf16
    # y_ref:   (TM, Coutp)   bf16  (pre-BN activations, written once per (o,i))
    # sum_ref: (1, 8, Coutp) f32   (grid-resident per outer block; 8 identical rows)
    # ssq_ref: (1, 8, Coutp) f32
    # acc_ref: (TM, Coutp)   f32   VMEM scratch (K accumulator)
    i = pl.program_id(1)          # inner-M index (stats reduction axis)
    k = pl.program_id(2)          # K-chunk index
    nk = pl.num_programs(2)

    @pl.when(k == 0)
    def _():
        acc_ref[...] = jnp.zeros_like(acc_ref)

    acc_ref[...] += jnp.dot(p_ref[...], w_ref[...],
                            preferred_element_type=jnp.float32)

    @pl.when(jnp.logical_and(i == 0, k == 0))
    def _():
        sum_ref[...] = jnp.zeros_like(sum_ref)
        ssq_ref[...] = jnp.zeros_like(ssq_ref)

    @pl.when(k == nk - 1)
    def _():
        y = acc_ref[...]                                 # f32 accumulator
        y_ref[...] = y.astype(y_ref.dtype)               # bf16 HBM writeback
        sum_ref[...] += jnp.sum(y, axis=0).reshape(1, 1, -1)
        ssq_ref[...] += jnp.sum(y * y, axis=0).reshape(1, 1, -1)


def _conv_stats_pallas(patches, w_mat, TM, TK, n_outer, n_inner):
    Mp, Kp = patches.shape
    Coutp = w_mat.shape[1]
    nk = Kp // TK
    grid = (n_outer, n_inner, nk)

    p_idx = lambda o, i, k: (o * n_inner + i, k)
    y_idx = lambda o, i, k: (o * n_inner + i, 0)
    stat_idx = lambda o, i, k: (o, 0, 0)

    # Weight is fetched once (constant block index) when there is no K split:
    # single-buffer it so VMEM is not wasted on a second copy.
    w_kwargs = dict(pipeline_mode=pl.Buffered(1)) if nk == 1 else {}
    w_spec = pl.BlockSpec((TK, Coutp), lambda o, i, k: (k, 0), **w_kwargs)

    # Working-set estimate -> explicit VMEM limit (v5e scoped default is 16 MiB).
    w_bufs = 1 if nk == 1 else 2
    est = (2 * TM * TK * 2            # patches tile, double-buffered, bf16
           + w_bufs * TK * Coutp * 2  # weight tile(s), bf16
           + 2 * TM * Coutp * 2       # y tile, double-buffered, bf16
           + TM * Coutp * 4           # f32 accumulator scratch
           + 4 * 8 * Coutp * 4)       # stats blocks
    vmem_limit = int(min(max(est + (4 << 20), 32 << 20), 64 << 20))

    return pl.pallas_call(
        _conv_stats_kernel,
        out_shape=(
            jax.ShapeDtypeStruct((Mp, Coutp), jnp.bfloat16),         # pre-BN activations
            jax.ShapeDtypeStruct((n_outer, 8, Coutp), jnp.float32),  # partial channel sums
            jax.ShapeDtypeStruct((n_outer, 8, Coutp), jnp.float32),  # partial channel sumsq
        ),
        grid=grid,
        in_specs=[
            pl.BlockSpec((TM, TK), p_idx),
            w_spec,
        ],
        out_specs=(
            pl.BlockSpec((TM, Coutp), y_idx),
            pl.BlockSpec((1, 8, Coutp), stat_idx),
            pl.BlockSpec((1, 8, Coutp), stat_idx),
        ),
        scratch_shapes=[pltpu.VMEM((TM, Coutp), jnp.float32)],
        compiler_params=pltpu.CompilerParams(
            dimension_semantics=("parallel", "arbitrary", "arbitrary"),
            vmem_limit_bytes=vmem_limit),
    )(patches, w_mat)


# ------------------------ pass 2: BN affine + LeakyReLU -----------------------
def _bn_lrelu_kernel(y_ref, scale_ref, shift_ref, o_ref):
    z = y_ref[...].astype(jnp.float32) * scale_ref[...] + shift_ref[...]
    o_ref[...] = jnp.where(z > 0, z, 0.2 * z)


def _bn_lrelu_pallas(y, scale, shift, TM):
    Mp, Coutp = y.shape
    grid = (Mp // TM,)
    est = 2 * TM * Coutp * 2 + 2 * TM * Coutp * 4 + 4 * Coutp * 4
    vmem_limit = int(min(max(est + (4 << 20), 32 << 20), 64 << 20))
    return pl.pallas_call(
        _bn_lrelu_kernel,
        out_shape=jax.ShapeDtypeStruct((Mp, Coutp), jnp.float32),
        grid=grid,
        in_specs=[
            pl.BlockSpec((TM, Coutp), lambda i: (i, 0)),
            pl.BlockSpec((1, Coutp), lambda i: (0, 0), pipeline_mode=pl.Buffered(1)),
            pl.BlockSpec((1, Coutp), lambda i: (0, 0), pipeline_mode=pl.Buffered(1)),
        ],
        out_specs=pl.BlockSpec((TM, Coutp), lambda i: (i, 0)),
        compiler_params=pltpu.CompilerParams(
            dimension_semantics=("parallel",),       # independent tiles -> both v7x TCs
            vmem_limit_bytes=vmem_limit),
    )(y, scale, shift)
    # TODO(synk): could alias the output over y (input_output_aliases) if the
    # downstream consumer accepts bf16, dropping one (Mp, Coutp) HBM allocation.


# --------------------------------- JAX glue ----------------------------------
def spectral_normalize(w, u, n_power_iterations=1, eps=1e-12):
    """PyTorch-style spectral norm: power iteration on W reshaped to (Cout, -1)."""
    w_mat = w.reshape(w.shape[0], -1)
    v = None
    for _ in range(n_power_iterations):
        v = w_mat.T @ u
        v = v / (jnp.linalg.norm(v) + eps)
        u = w_mat @ v
        u = u / (jnp.linalg.norm(u) + eps)
    sigma = u @ (w_mat @ v)
    # TODO(synk): PyTorch also persists the updated `u` buffer (training side effect).
    return w / sigma


def im2col_s2_k4_p1_nhwc_bf16(x_nchw):
    """NCHW input -> (N*OH*OW, Cin*16) bf16 patches for kernel=4, stride=2, pad=1.

    Works in NHWC so the 16 shifted slices are lane-contiguous; casts to bf16
    BEFORE stacking so XLA never materializes f32 patches (16x input size).
    Column order is c*16 + kh*4 + kw to match weight.reshape(Cout, Cin*KH*KW).
    """
    N, C, H, W = x_nchw.shape
    OH, OW = H // 2, W // 2
    x = jnp.transpose(x_nchw, (0, 2, 3, 1)).astype(jnp.bfloat16)       # NHWC bf16 early
    xp = jnp.pad(x, ((0, 0), (1, 1), (1, 1), (0, 0)))
    cols = []
    for kh in range(4):
        for kw in range(4):
            cols.append(xp[:, kh:kh + 2 * OH:2, kw:kw + 2 * OW:2, :])  # (N,OH,OW,C)
    patches = jnp.stack(cols, axis=-1)                                 # (N,OH,OW,C,16)
    return patches.reshape(N * OH * OW, C * 16), (N, OH, OW)
    # TODO(synk): patch extraction could move fully in-kernel (pl.ANY + manual DMA
    # of input row bands) to remove this remaining HBM round trip.


def _pick_tiles(M, K, Coutp, budget_bytes=20 << 20):
    """Choose (TM, TK, Kp) so the pass-1 working set stays inside a budget that
    fits every generation (v7x: 32 MiB scoped / 64 MiB physical VMEM)."""
    if K <= 2048:
        TK, Kp = K, K
    else:
        TK = 2048
        Kp = _round_up(K, TK)
    w_bufs = 1 if Kp == TK else 2
    per_row = 4 * TK + 8 * Coutp                       # patches dbuf + y dbuf + acc
    fixed = w_bufs * TK * Coutp * 2 + 4 * 8 * Coutp * 4
    tm_budget = max((budget_bytes - fixed) // per_row, 8)
    TM = int(min(2048, _round_up(M, 8), (tm_budget // 8) * 8))
    TM = max(TM, 8)
    return TM, TK, Kp


@functools.partial(jax.jit, static_argnames=("channels_last",))
def downblock_forward(x, conv_w, sn_u, bn_gamma, bn_beta, *, channels_last=False):
    """x: (N, Cin, H, W) f32 NCHW -> (N, Cout, H/2, W/2) f32 (NCHW by default)."""
    eps = 1e-5
    N, Cin, H, W = x.shape
    Cout = conv_w.shape[0]
    OH, OW = H // 2, W // 2
    M = N * OH * OW
    K = Cin * 16

    # Spectral norm (parameter preprocessing, matches torch.nn.utils.spectral_norm).
    w_sn = spectral_normalize(conv_w.astype(jnp.float32), sn_u.astype(jnp.float32))
    w_mat = w_sn.reshape(Cout, K).T                                    # (K, Cout)

    # Lane-dense out-channel axis (pad to multiple of 128); bf16 MXU operands.
    Coutp = _round_up(Cout, 128)
    TM, TK, Kp = _pick_tiles(M, K, Coutp)

    # Row tiling + outer "parallel" split (2 chunks so v7x's 2 TCs share pass 1).
    nt = pl.cdiv(M, TM)
    n_outer = 2 if nt >= 2 else 1
    n_inner = pl.cdiv(nt, n_outer)
    Mp = n_outer * n_inner * TM

    w_mat = jnp.pad(w_mat, ((0, Kp - K), (0, Coutp - Cout))).astype(jnp.bfloat16)

    patches, _ = im2col_s2_k4_p1_nhwc_bf16(x)                          # (M, K) bf16
    patches = jnp.pad(patches, ((0, Mp - M), (0, Kp - K)))             # zero rows: no stat effect

    # Pass 1: tiled matmul (MXU, f32 accumulate) + per-channel sum / sum-of-squares.
    y, sums, ssqs = _conv_stats_pallas(patches, w_mat, TM, TK, n_outer, n_inner)

    # Fold BatchNorm (training-mode biased batch stats) into per-channel (scale, shift).
    s = jnp.sum(sums[:, 0, :], axis=0, keepdims=True)                  # (1, Coutp)
    ssq = jnp.sum(ssqs[:, 0, :], axis=0, keepdims=True)
    gamma_p = jnp.pad(bn_gamma.astype(jnp.float32), (0, Coutp - Cout)).reshape(1, Coutp)
    beta_p = jnp.pad(bn_beta.astype(jnp.float32), (0, Coutp - Cout)).reshape(1, Coutp)
    inv_m = jnp.float32(1.0 / M)                                       # true rows only
    mean = s * inv_m
    var = jnp.maximum(ssq * inv_m - mean * mean, 0.0)                  # clamp f32 cancellation
    scale = gamma_p * jax.lax.rsqrt(var + eps)
    shift = beta_p - mean * scale
    # TODO(synk): running_mean / running_var buffers are not updated/returned.

    # Pass 2: tiled normalize + LeakyReLU(0.2); grow the tile if VMEM allows.
    total_tiles = n_outer * n_inner
    TM2 = TM
    for d in (16, 8, 4, 2, 1):
        if total_tiles % d == 0 and TM * d <= 4096 and 12 * TM * d * Coutp <= (24 << 20):
            TM2 = TM * d
            break
    out_flat = _bn_lrelu_pallas(y, scale, shift, TM2)                  # (Mp, Coutp) f32

    # Strip padding; channels-last is the cheap layout (lane-dense stores kept).
    out = out_flat[:M, :Cout].reshape(N, OH, OW, Cout)
    if channels_last:
        return out
    # NCHW to match the PyTorch module; pass channels_last=True downstream to
    # skip this extra full-output HBM transpose pass.
    return out.transpose(0, 3, 1, 2)


# ----------------------------------- demo ------------------------------------
if __name__ == "__main__":
    key = jax.random.PRNGKey(0)
    k_x, k_w, k_u = jax.random.split(key, 3)

    N, Cin, H, W = 2, 4, 16, 16
    Cout, KH, KW = 8, 4, 4

    x = jax.random.normal(k_x, (N, Cin, H, W), dtype=jnp.float32)

    # Conv2d(in_ch=4, out_ch=8, kernel=4, stride=2, padding=1, bias=False)
    fan_in = Cin * KH * KW
    conv_w = jax.random.normal(k_w, (Cout, Cin, KH, KW), dtype=jnp.float32) / jnp.sqrt(fan_in)
    # spectral_norm power-iteration vector u (normalized gaussian, like PyTorch init)
    sn_u = jax.random.normal(k_u, (Cout,), dtype=jnp.float32)
    sn_u = sn_u / (jnp.linalg.norm(sn_u) + 1e-12)
    # BatchNorm2d(out_ch) default affine init: weight=1, bias=0
    bn_gamma = jnp.ones((Cout,), dtype=jnp.float32)
    bn_beta = jnp.zeros((Cout,), dtype=jnp.float32)

    y = downblock_forward(x, conv_w, sn_u, bn_gamma, bn_beta)
    jax.block_until_ready(y)

    assert y.shape == (N, Cout, H // 2, W // 2), y.shape
    assert bool(jnp.all(jnp.isfinite(y)))
    print("KERNEL_OK")
</pallas_src>

<mosaic_0001>
module attributes {stable_mosaic.version = 11 : i64} {
  func.func @_conv_stats_kernel(%arg0: i32, %arg1: i32, %arg2: i32, %arg3: memref<128x64xbf16, #tpu.memory_space<vmem>>, %arg4: memref<64x128xbf16, #tpu.memory_space<vmem>>, %arg5: memref<128x128xbf16, #tpu.memory_space<vmem>>, %arg6: memref<1x8x128xf32, #tpu.memory_space<vmem>>, %arg7: memref<1x8x128xf32, #tpu.memory_space<vmem>>, %arg8: memref<128x128xf32, #tpu.memory_space<vmem>>) attributes {dimension_semantics = [#tpu.dimension_semantics<parallel>, #tpu.dimension_semantics<arbitrary>, #tpu.dimension_semantics<arbitrary>], iteration_bounds = array<i64: 1, 1, 1>, scalar_prefetch = 0 : i64, scratch_operands = 1 : i64, tpu.core_type = #tpu.core_type<tc>, window_params = [{transform_indices = @transform_0, window_bounds = array<i64: 128, 64>}, {pipeline_mode = #tpu.pipeline_mode<synchronous>, transform_indices = @transform_1, window_bounds = array<i64: 64, 128>}, {transform_indices = @transform_2, window_bounds = array<i64: 128, 128>}, {transform_indices = @transform_3, window_bounds = array<i64: 1, 8, 128>}, {transform_indices = @transform_4, window_bounds = array<i64: 1, 8, 128>}]} {
    %c0_i32 = arith.constant 0 : i32
    %0 = arith.cmpi eq, %arg2, %c0_i32 : i32
    %1 = arith.extui %0 : i1 to i32
    %c0_i32_0 = arith.constant 0 : i32
    %2 = arith.cmpi ne, %1, %c0_i32_0 : i32
    scf.if %2 {
      %cst_13 = arith.constant 0.000000e+00 : f32
      %17 = vector.broadcast %cst_13 : f32 to vector<128x128xf32>
      %c0_14 = arith.constant 0 : index
      %c0_15 = arith.constant 0 : index
      %18 = vector.load %arg8[%c0_14, %c0_15] : memref<128x128xf32, #tpu.memory_space<vmem>>, vector<128x128xf32>
      tpu.vector_store %arg8[%c0_14, %c0_15], %17 {strides = array<i32>} : memref<128x128xf32, #tpu.memory_space<vmem>>, vector<128x128xf32>,
    } else {
    }
    %c0 = arith.constant 0 : index
    %c0_1 = arith.constant 0 : index
    %3 = vector.load %arg8[%c0, %c0_1] : memref<128x128xf32, #tpu.memory_space<vmem>>, vector<128x128xf32>
    %c0_2 = arith.constant 0 : index
    %c0_3 = arith.constant 0 : index
    %4 = vector.load %arg3[%c0_2, %c0_3] : memref<128x64xbf16, #tpu.memory_space<vmem>>, vector<128x64xbf16>
    %c0_4 = arith.constant 0 : index
    %c0_5 = arith.constant 0 : index
    %5 = vector.load %arg4[%c0_4, %c0_5] : memref<64x128xbf16, #tpu.memory_space<vmem>>, vector<64x128xbf16>
    %cst = arith.constant dense<0.000000e+00> : vector<128x128xf32>
    %6 = tpu.matmul %4, %5, %cst {dimension_numbers = #tpu.dot_dimension_numbers<[1], [0], [0], [1], [0, 0, 1, 1], [], []>} : vector<128x64xbf16>, vector<64x128xbf16>, vector<128x128xf32> -> vector<128x128xf32>
    %7 = arith.addf %3, %6 : vector<128x128xf32>
    %c0_6 = arith.constant 0 : index
    %c0_7 = arith.constant 0 : index
    %8 = vector.load %arg8[%c0_6, %c0_7] : memref<128x128xf32, #tpu.memory_space<vmem>>, vector<128x128xf32>
    tpu.vector_store %arg8[%c0_6, %c0_7], %7 {strides = array<i32>} : memref<128x128xf32, #tpu.memory_space<vmem>>, vector<128x128xf32>,
    %c0_i32_8 = arith.constant 0 : i32
    %9 = arith.cmpi eq, %arg1, %c0_i32_8 : i32
    %c0_i32_9 = arith.constant 0 : i32
    %10 = arith.cmpi eq, %arg2, %c0_i32_9 : i32
    %11 = arith.andi %9, %10 : i1
    %12 = arith.extui %11 : i1 to i32
    %c0_i32_10 = arith.constant 0 : i32
    %13 = arith.cmpi ne, %12, %c0_i32_10 : i32
    scf.if %13 {
      %cst_13 = arith.constant 0.000000e+00 : f32
      %17 = vector.broadcast %cst_13 : f32 to vector<1x8x128xf32>
      %c0_14 = arith.constant 0 : index
      %c0_15 = arith.constant 0 : index
      %c0_16 = arith.constant 0 : index
      %18 = vector.load %arg6[%c0_14, %c0_15, %c0_16] : memref<1x8x128xf32, #tpu.memory_space<vmem>>, vector<1x8x128xf32>
      tpu.vector_store %arg6[%c0_14, %c0_15, %c0_16], %17 {strides = array<i32>} : memref<1x8x128xf32, #tpu.memory_space<vmem>>, vector<1x8x128xf32>,
      %cst_17 = arith.constant 0.000000e+00 : f32
      %19 = vector.broadcast %cst_17 : f32 to vector<1x8x128xf32>
      %c0_18 = arith.constant 0 : index
      %c0_19 = arith.constant 0 : index
      %c0_20 = arith.constant 0 : index
      %20 = vector.load %arg7[%c0_18, %c0_19, %c0_20] : memref<1x8x128xf32, #tpu.memory_space<vmem>>, vector<1x8x128xf32>
      tpu.vector_store %arg7[%c0_18, %c0_19, %c0_20], %19 {strides = array<i32>} : memref<1x8x128xf32, #tpu.memory_space<vmem>>, vector<1x8x128xf32>,
    } else {
    }
    %c0_i32_11 = arith.constant 0 : i32
    %14 = arith.cmpi eq, %arg2, %c0_i32_11 : i32
    %15 = arith.extui %14 : i1 to i32
    %c0_i32_12 = arith.constant 0 : i32
    %16 = arith.cmpi ne, %15, %c0_i32_12 : i32
    scf.if %16 {
      %c0_13 = arith.constant 0 : index
      %c0_14 = arith.constant 0 : index
      %17 = vector.load %arg8[%c0_13, %c0_14] : memref<128x128xf32, #tpu.memory_space<vmem>>, vector<128x128xf32>
      %18 = arith.truncf %17 : vector<128x128xf32> to vector<128x128xbf16>
      %c0_15 = arith.constant 0 : index
      %c0_16 = arith.constant 0 : index
      %19 = vector.load %arg5[%c0_15, %c0_16] : memref<128x128xbf16, #tpu.memory_space<vmem>>, vector<128x128xbf16>
      tpu.vector_store %arg5[%c0_15, %c0_16], %18 {strides = array<i32>} : memref<128x128xbf16, #tpu.memory_space<vmem>>, vector<128x128xbf16>,
      %c0_17 = arith.constant 0 : index
      %c0_18 = arith.constant 0 : index
      %c0_19 = arith.constant 0 : index
      %20 = vector.load %arg6[%c0_17, %c0_18, %c0_19] : memref<1x8x128xf32, #tpu.memory_space<vmem>>, vector<1x8x128xf32>
      %cst_20 = arith.constant dense<0.000000e+00> : vector<128xf32>
      %21 = vector.multi_reduction <add>, %17, %cst_20 [0] : vector<128x128xf32> to vector<128xf32>
      %22 = vector.shape_cast %21 : vector<128xf32> to vector<1x1x128xf32>
      %23 = vector.broadcast %22 : vector<1x1x128xf32> to vector<1x8x128xf32>
      %24 = arith.addf %20, %23 : vector<1x8x128xf32>
      %c0_21 = arith.constant 0 : index
      %c0_22 = arith.constant 0 : index
      %c0_23 = arith.constant 0 : index
      %25 = vector.load %arg6[%c0_21, %c0_22, %c0_23] : memref<1x8x128xf32, #tpu.memory_space<vmem>>, vector<1x8x128xf32>
      tpu.vector_store %arg6[%c0_21, %c0_22, %c0_23], %24 {strides = array<i32>} : memref<1x8x128xf32, #tpu.memory_space<vmem>>, vector<1x8x128xf32>,
      %c0_24 = arith.constant 0 : index
      %c0_25 = arith.constant 0 : index
      %c0_26 = arith.constant 0 : index
      %26 = vector.load %arg7[%c0_24, %c0_25, %c0_26] : memref<1x8x128xf32, #tpu.memory_space<vmem>>, vector<1x8x128xf32>
      %27 = arith.mulf %17, %17 : vector<128x128xf32>
      %cst_27 = arith.constant dense<0.000000e+00> : vector<128xf32>
      %28 = vector.multi_reduction <add>, %27, %cst_27 [0] : vector<128x128xf32> to vector<128xf32>
      %29 = vector.shape_cast %28 : vector<128xf32> to vector<1x1x128xf32>
      %30 = vector.broadcast %29 : vector<1x1x128xf32> to vector<1x8x128xf32>
      %31 = arith.addf %26, %30 : vector<1x8x128xf32>
      %c0_28 = arith.constant 0 : index
      %c0_29 = arith.constant 0 : index
      %c0_30 = arith.constant 0 : index
      %32 = vector.load %arg7[%c0_28, %c0_29, %c0_30] : memref<1x8x128xf32, #tpu.memory_space<vmem>>, vector<1x8x128xf32>
      tpu.vector_store %arg7[%c0_28, %c0_29, %c0_30], %31 {strides = array<i32>} : memref<1x8x128xf32, #tpu.memory_space<vmem>>, vector<1x8x128xf32>,
    } else {
    }
    return
  }
  func.func @transform_0(%arg0: i32, %arg1: i32, %arg2: i32) -> (i32, i32) {
    %c1_i32 = arith.constant 1 : i32
    %0 = arith.muli %arg0, %c1_i32 : i32
    %1 = arith.addi %0, %arg1 : i32
    %c0_i32 = arith.constant 0 : i32
    return %1, %arg2 : i32, i32
  }
  func.func @transform_1(%arg0: i32, %arg1: i32, %arg2: i32) -> (i32, i32) {
    %c0_i32 = arith.constant 0 : i32
    %c0_i32_0 = arith.constant 0 : i32
    return %arg2, %c0_i32 : i32, i32
  }
  func.func @transform_2(%arg0: i32, %arg1: i32, %arg2: i32) -> (i32, i32) {
    %c1_i32 = arith.constant 1 : i32
    %0 = arith.muli %arg0, %c1_i32 : i32
    %1 = arith.addi %0, %arg1 : i32
    %c0_i32 = arith.constant 0 : i32
    %c0_i32_0 = arith.constant 0 : i32
    return %1, %c0_i32 : i32, i32
  }
  func.func @transform_3(%arg0: i32, %arg1: i32, %arg2: i32) -> (i32, i32, i32) {
    %c0_i32 = arith.constant 0 : i32
    %c0_i32_0 = arith.constant 0 : i32
    %c0_i32_1 = arith.constant 0 : i32
    return %arg0, %c0_i32, %c0_i32_0 : i32, i32, i32
  }
  func.func @transform_4(%arg0: i32, %arg1: i32, %arg2: i32) -> (i32, i32, i32) {
    %c0_i32 = arith.constant 0 : i32
    %c0_i32_0 = arith.constant 0 : i32
    %c0_i32_1 = arith.constant 0 : i32
    return %arg0, %c0_i32, %c0_i32_0 : i32, i32, i32
  }
}

module attributes {stable_mosaic.version = 11 : i64} {
  func.func @_bn_lrelu_kernel(%arg0: i32, %arg1: memref<128x128xbf16, #tpu.memory_space<vmem>>, %arg2: memref<1x128xf32, #tpu.memory_space<vmem>>, %arg3: memref<1x128xf32, #tpu.memory_space<vmem>>, %arg4: memref<128x128xf32, #tpu.memory_space<vmem>>) attributes {dimension_semantics = [#tpu.dimension_semantics<parallel>], iteration_bounds = array<i64: 1>, scalar_prefetch = 0 : i64, scratch_operands = 0 : i64, tpu.core_type = #tpu.core_type<tc>, window_params = [{transform_indices = @transform_0, window_bounds = array<i64: 128, 128>}, {pipeline_mode = #tpu.pipeline_mode<synchronous>, transform_indices = @transform_1, window_bounds = array<i64: 1, 128>}, {pipeline_mode = #tpu.pipeline_mode<synchronous>, transform_indices = @transform_2, window_bounds = array<i64: 1, 128>}, {transform_indices = @transform_3, window_bounds = array<i64: 128, 128>}]} {
    %c0 = arith.constant 0 : index
    %c0_0 = arith.constant 0 : index
    %0 = vector.load %arg1[%c0, %c0_0] : memref<128x128xbf16, #tpu.memory_space<vmem>>, vector<128x128xbf16>
    %1 = arith.extf %0 : vector<128x128xbf16> to vector<128x128xf32>
    %c0_1 = arith.constant 0 : index
    %c0_2 = arith.constant 0 : index
    %2 = vector.load %arg2[%c0_1, %c0_2] : memref<1x128xf32, #tpu.memory_space<vmem>>, vector<1x128xf32>
    %3 = vector.broadcast %2 : vector<1x128xf32> to vector<128x128xf32>
    %4 = arith.mulf %1, %3 : vector<128x128xf32>
    %c0_3 = arith.constant 0 : index
    %c0_4 = arith.constant 0 : index
    %5 = vector.load %arg3[%c0_3, %c0_4] : memref<1x128xf32, #tpu.memory_space<vmem>>, vector<1x128xf32>
    %6 = vector.broadcast %5 : vector<1x128xf32> to vector<128x128xf32>
    %7 = arith.addf %4, %6 : vector<128x128xf32>
    %cst = arith.constant 0.000000e+00 : f32
    %8 = vector.broadcast %cst : f32 to vector<128x128xf32>
    %9 = arith.cmpf ogt, %7, %8 : vector<128x128xf32>
    %cst_5 = arith.constant 2.000000e-01 : f32
    %10 = vector.broadcast %cst_5 : f32 to vector<128x128xf32>
    %11 = arith.mulf %10, %7 : vector<128x128xf32>
    %12 = arith.select %9, %7, %11 : vector<128x128xi1>, vector<128x128xf32>
    %c0_6 = arith.constant 0 : index
    %c0_7 = arith.constant 0 : index
    %13 = vector.load %arg4[%c0_6, %c0_7] : memref<128x128xf32, #tpu.memory_space<vmem>>, vector<128x128xf32>
    tpu.vector_store %arg4[%c0_6, %c0_7], %12 {strides = array<i32>} : memref<128x128xf32, #tpu.memory_space<vmem>>, vector<128x128xf32>,
    return
  }
  func.func @transform_0(%arg0: i32) -> (i32, i32) {
    %c0_i32 = arith.constant 0 : i32
    %c0_i32_0 = arith.constant 0 : i32
    return %arg0, %c0_i32 : i32, i32
  }
  func.func @transform_1(%arg0: i32) -> (i32, i32) {
    %c0_i32 = arith.constant 0 : i32
    %c0_i32_0 = arith.constant 0 : i32
    %c0_i32_1 = arith.constant 0 : i32
    return %c0_i32, %c0_i32_0 : i32, i32
  }
  func.func @transform_2(%arg0: i32) -> (i32, i32) {
    %c0_i32 = arith.constant 0 : i32
    %c0_i32_0 = arith.constant 0 : i32
    %c0_i32_1 = arith.constant 0 : i32
    return %c0_i32, %c0_i32_0 : i32, i32
  }
  func.func @transform_3(%arg0: i32) -> (i32, i32) {
    %c0_i32 = arith.constant 0 : i32
    %c0_i32_0 = arith.constant 0 : i32
    return %arg0, %c0_i32 : i32, i32
  }
}

</mosaic_0001>

<bundles_post_ra>
// kernel: downblock_forward.3
= control target key start
LH: loop header
LB: loop body
LE: loop exit
PB: predicated region body
PF: predicated region fallthrough
CT: control target
= control target key end

     0   :  { %s335_s0 = inlined_call_operand.vmem [shape: bf16[128,128], index: 0, kind: input, shape index: {}]   ;;  %s336_s1 = inlined_call_operand.vmem [shape: f32[1,128], index: 1, kind: input, shape index: {}]   ;;  %s337_s2 = inlined_call_operand.vmem [shape: f32[1,128], index: 2, kind: input, shape index: {}]   ;;  %s338_s3 = inlined_call_operand.vmem [shape: f32[128,128], index: 3, kind: output, shape index: {}]  }
   0x1   :  { %v163_v0 = vld [vmem:[%s335_s0] sm:$0xff]   ;;  %v194_v4 = vld [vmem:[%s335_s0 + $0x8] sm:$0xff]   ;;  %v195_v5 = vld [vmem:[%s335_s0 + $0x10] sm:$0xff]  }
   0x2   :  { %v227_v1 = vld [vmem:[%s336_s1] ss:$0 sm:$0xff]  ;;  %v164_v2 = vunpack.c.l.bf16 %v163_v0  ;;  %v165_v3 = vunpack.c.h.bf16 %v163_v0  ;;  %v196_v6 = vld [vmem:[%s335_s0 + $0x18] sm:$0xff]   ;;  %v168_v8 = vunpack.c.l.bf16 %v194_v4  ;;  %v169_v9 = vunpack.c.h.bf16 %v194_v4  ;;  %v198_v36 = vld [vmem:[%s335_s0 + $0x28] sm:$0xff]  }
   0x3   :  { %v241_v7 = vld [vmem:[%s337_s2] ss:$0 sm:$0xff]  ;;  %v172_v10 = vunpack.c.l.bf16 %v195_v5  ;;  %v173_v11 = vunpack.c.h.bf16 %v195_v5  ;;  %v176_v14 = vunpack.c.l.bf16 %v196_v6  ;;  %v177_v15 = vunpack.c.h.bf16 %v196_v6  ;;  %v199_v48 = vld [vmem:[%s335_s0 + $0x30] sm:$0xff]   ;;  %v200_v55 = vld [vmem:[%s335_s0 + $0x38] sm:$0xff]  }
   0x4   :  { %v53_v12 = vmul.f32 %v164_v2, %v227_v1  ;;  %v54_v13 = vmul.f32 %v165_v3, %v227_v1  ;;  %v55_v16 = vmul.f32 %v168_v8, %v227_v1  ;;  %v56_v17 = vmul.f32 %v169_v9, %v227_v1  ;;  %v197_v28 = vld [vmem:[%s335_s0 + $0x20] sm:$0xff]  }
   0x5   :  { %v57_v18 = vmul.f32 %v172_v10, %v227_v1  ;;  %v58_v19 = vmul.f32 %v173_v11, %v227_v1  ;;  %v59_v22 = vmul.f32 %v176_v14, %v227_v1  ;;  %v60_v23 = vmul.f32 %v177_v15, %v227_v1 }
   0x6   :  { %v76_v20 = vadd.f32 %v241_v7, %v53_v12  ;;  %v77_v21 = vadd.f32 %v241_v7, %v54_v13  ;;  %v78_v24 = vadd.f32 %v241_v7, %v55_v16  ;;  %v79_v25 = vadd.f32 %v241_v7, %v56_v17 }
   0x7   :  { %v80_v26 = vadd.f32 %v241_v7, %v57_v18  ;;  %v81_v27 = vadd.f32 %v241_v7, %v58_v19  ;;  %v82_v41 = vadd.f32 %v241_v7, %v59_v22  ;;  %v83_v42 = vadd.f32 %v241_v7, %v60_v23 }
   0x8   :  { %vm92_vm0 = vcmp.gt.f32.partialorder %v76_v20, 0.0  ;;  %v108_v29 = vmul.f32 0.2, %v76_v20  ;;  %vm93_vm1 = vcmp.gt.f32.partialorder %v77_v21, 0.0  ;;  %v109_v30 = vmul.f32 0.2, %v77_v21 }
   0x9   :  { %vm94_vm2 = vcmp.gt.f32.partialorder %v78_v24, 0.0  ;;  %v110_v31 = vmul.f32 0.2, %v78_v24  ;;  %vm95_vm3 = vcmp.gt.f32.partialorder %v79_v25, 0.0  ;;  %v111_v32 = vmul.f32 0.2, %v79_v25 }
   0xa   :  { %v124_v33 = vsel %vm92_vm0, %v76_v20, %v108_v29  ;;  %v125_v34 = vsel %vm93_vm1, %v77_v21, %v109_v30  ;;  %vm96_vm4 = vcmp.gt.f32.partialorder %v80_v26, 0.0  ;;  %v112_v35 = vmul.f32 0.2, %v80_v26 }
   0xb   :  { %140 = vst [vmem:[%s338_s3] sm:$0xff] %v124_v33  ;;  %141 = vst [vmem:[%s338_s3 + $0x8] sm:$0xff] %v125_v34  ;;  %v126_v37 = vsel %vm94_vm2, %v78_v24, %v110_v31  ;;  %v127_v38 = vsel %vm95_vm3, %v79_v25, %v111_v32  ;;  %vm97_vm5 = vcmp.gt.f32.partialorder %v81_v27, 0.0  ;;  %v113_v39 = vmul.f32 0.2, %v81_v27 }
   0xc   :  { %142 = vst [vmem:[%s338_s3 + $0x10] sm:$0xff] %v126_v37  ;;  %143 = vst [vmem:[%s338_s3 + $0x18] sm:$0xff] %v127_v38  ;;  %v128_v40 = vsel %vm96_vm4, %v80_v26, %v112_v35  ;;  %v180_v43 = vunpack.c.l.bf16 %v197_v28  ;;  %v181_v45 = vunpack.c.h.bf16 %v197_v28  ;;  %v184_v46 = vunpack.c.l.bf16 %v198_v36 }
   0xd   :  { %144 = vst [vmem:[%s338_s3 + $0x20] sm:$0xff] %v128_v40  ;;  %v129_v44 = vsel %vm97_vm5, %v81_v27, %v113_v39  ;;  %v185_v47 = vunpack.c.h.bf16 %v198_v36  ;;  %vm98_vm6 = vcmp.gt.f32.partialorder %v82_v41, 0.0  ;;  %v114_v49 = vmul.f32 0.2, %v82_v41 }
   0xe   :  { %145 = vst [vmem:[%s338_s3 + $0x28] sm:$0xff] %v129_v44  ;;  %vm99_vm7 = vcmp.gt.f32.partialorder %v83_v42, 0.0  ;;  %v115_v50 = vmul.f32 0.2, %v83_v42  ;;  %v61_v51 = vmul.f32 %v180_v43, %v227_v1  ;;  %v62_v52 = vmul.f32 %v181_v45, %v227_v1 }
   0xf   :  { %v63_v53 = vmul.f32 %v184_v46, %v227_v1  ;;  %v64_v54 = vmul.f32 %v185_v47, %v227_v1  ;;  %v130_v56 = vsel %vm98_vm6, %v82_v41, %v114_v49  ;;  %v188_v58 = vunpack.c.l.bf16 %v199_v48 }
  0x10   :  { %v131_v57 = vsel %vm99_vm7, %v83_v42, %v115_v50  ;;  %v189_v59 = vunpack.c.h.bf16 %v199_v48  ;;  %146 = vst [vmem:[%s338_s3 + $0x30] sm:$0xff] %v130_v56  ;;  %v84_v60 = vadd.f32 %v241_v7, %v61_v51  ;;  %v85_v61 = vadd.f32 %v241_v7, %v62_v52 }
  0x11   :  { %147 = vst [vmem:[%s338_s3 + $0x38] sm:$0xff] %v131_v57  ;;  %v86_v62 = vadd.f32 %v241_v7, %v63_v53  ;;  %v87_v63 = vadd.f32 %v241_v7, %v64_v54  ;;  %v65_v0 = vmul.f32 %v188_v58, %v227_v1  ;;  %v192_v3 = vunpack.c.l.bf16 %v200_v55 }
  0x12   :  { %v66_v2 = vmul.f32 %v189_v59, %v227_v1  ;;  %v193_v4 = vunpack.c.h.bf16 %v200_v55  ;;  %vm100_vm8 = vcmp.gt.f32.partialorder %v84_v60, 0.0  ;;  %v116_v5 = vmul.f32 0.2, %v84_v60 }
  0x13   :  { %vm101_vm9 = vcmp.gt.f32.partialorder %v85_v61, 0.0  ;;  %v117_v6 = vmul.f32 0.2, %v85_v61  ;;  %vm102_vm10 = vcmp.gt.f32.partialorder %v86_v62, 0.0  ;;  %v118_v8 = vmul.f32 0.2, %v86_v62 }
  0x14   :  { %vm103_vm11 = vcmp.gt.f32.partialorder %v87_v63, 0.0  ;;  %v119_v9 = vmul.f32 0.2, %v87_v63  ;;  %v132_v10 = vsel %vm100_vm8, %v84_v60, %v116_v5  ;;  %v88_v12 = vadd.f32 %v241_v7, %v65_v0 }
  0x15   :  { %v133_v11 = vsel %vm101_vm9, %v85_v61, %v117_v6  ;;  %v89_v13 = vadd.f32 %v241_v7, %v66_v2  ;;  %148 = vst [vmem:[%s338_s3 + $0x40] sm:$0xff] %v132_v10  ;;  %v134_v14 = vsel %vm102_vm10, %v86_v62, %v118_v8  ;;  %v67_v16 = vmul.f32 %v192_v3, %v227_v1 }
  0x16   :  { %149 = vst [vmem:[%s338_s3 + $0x48] sm:$0xff] %v133_v11  ;;  %v135_v15 = vsel %vm103_vm11, %v87_v63, %v119_v9  ;;  %v68_v17 = vmul.f32 %v193_v4, %v227_v1  ;;  %150 = vst [vmem:[%s338_s3 + $0x50] sm:$0xff] %v134_v14  ;;  %vm104_vm12 = vcmp.gt.f32.partialorder %v88_v12, 0.0  ;;  %v120_v18 = vmul.f32 0.2, %v88_v12 }
  0x17   :  { %151 = vst [vmem:[%s338_s3 + $0x58] sm:$0xff] %v135_v15  ;;  %vm105_vm13 = vcmp.gt.f32.partialorder %v89_v13, 0.0  ;;  %v121_v19 = vmul.f32 0.2, %v89_v13  ;;  %v90_v20 = vadd.f32 %v241_v7, %v67_v16 }
  0x18   :  { %v91_v21 = vadd.f32 %v241_v7, %v68_v17  ;;  %v136_v22 = vsel %vm104_vm12, %v88_v12, %v120_v18 }
  0x19   :  { %v137_v23 = vsel %vm105_vm13, %v89_v13, %v121_v19  ;;  %152 = vst [vmem:[%s338_s3 + $0x60] sm:$0xff] %v136_v22  ;;  %vm106_vm14 = vcmp.gt.f32.partialorder %v90_v20, 0.0  ;;  %v122_v1 = vmul.f32 0.2, %v90_v20 }
  0x1a   :  { %153 = vst [vmem:[%s338_s3 + $0x68] sm:$0xff] %v137_v23  ;;  %vm107_vm15 = vcmp.gt.f32.partialorder %v91_v21, 0.0  ;;  %v123_v24 = vmul.f32 0.2, %v91_v21 }
  0x1b   :  { %v138_v25 = vsel %vm106_vm14, %v90_v20, %v122_v1 }
  0x1c   :  { %v139_v26 = vsel %vm107_vm15, %v91_v21, %v123_v24  ;;  %154 = vst [vmem:[%s338_s3 + $0x70] sm:$0xff] %v138_v25 }
  0x1d   :  { %155 = vst [vmem:[%s338_s3 + $0x78] sm:$0xff] %v139_v26 }

// kernel: downblock_forward.2
= control target key start
LH: loop header
LB: loop body
LE: loop exit
PB: predicated region body
PF: predicated region fallthrough
CT: control target
= control target key end

     0   :  { %vm175_vm0 = vcmask 523264   ;;  %s794_s1 = inlined_call_operand.vmem [shape: bf16[64,128], index: 1, kind: input, shape index: {}]   ;;  %s795_s0 = inlined_call_operand.vmem [shape: bf16[128,64], index: 0, kind: input, shape index: {}]   ;;  %s796_s2 = inlined_call_operand.vmem [shape: bf16[128,128], index: 2, kind: output, shape index: {0}]   ;;  %s797_s3 = inlined_call_operand.vmem [shape: f32[1,8,128], index: 3, kind: output, shape index: {1}]   ;;  %s798_s4 = inlined_call_operand.vmem [shape: f32[1,8,128], index: 4, kind: output, shape index: {2}]  }
   0x1   :  { %v683_v0 = vld [vmem:[%s794_s1 + $0x18] sm:$0xff]   ;;  %v684_v1 = vld [vmem:[%s794_s1 + $0x10] sm:$0xff]   ;;  %v685_v2 = vld [vmem:[%s794_s1 + $0x8] sm:$0xff]  }
   0x2   :  { %650 = vmatprep.subr.bf16.mxu0 %v683_v0  ;;  %674 = vmatprep.subr.bf16.mxu1 %v683_v0  ;;  %v687_v3 = vld [vmem:[%s795_s0] sm:$0xff]   ;;  %v688_v6 = vld [vmem:[%s795_s0 + $0x8] sm:$0xff]   ;;  %v689_v8 = vld [vmem:[%s795_s0 + $0x10] sm:$0xff]  }
   0x3   :  { %651 = vmatpush3.bf16.msra.mxu0 %v683_v0  ;;  %678 = vmatpush3.bf16.msra.mxu1 %v683_v0  ;;  %v686_v4 = vld [vmem:[%s794_s1] sm:$0xff]   ;;  %v692_v7 = vld [vmem:[%s795_s0 + $0x28] sm:$0xff]   ;;  %v693_v9 = vld [vmem:[%s795_s0 + $0x30] sm:$0xff]  }
   0x4   :  { %652 = vmatprep.subr.bf16.mxu0 %v684_v1  ;;  %675 = vmatprep.subr.bf16.mxu1 %v684_v1  ;;  %v691_v5 = vld [vmem:[%s795_s0 + $0x20] sm:$0xff]   ;;  %v690_v10 = vld [vmem:[%s795_s0 + $0x18] sm:$0xff]  }
   0x5   :  { %658 = vmatprep.mubr.msk.bf16.mxu0 %vm175_vm0, %v687_v3  ;;  %666 = vmatprep.mubr.msk.bf16.mxu1 %vm175_vm0, %v691_v5  ;;  %v694_v11 = vld [vmem:[%s795_s0 + $0x38] sm:$0xff]  }
   0x7   :  { %653 = vmatpush3.bf16.msra.mxu0 %v684_v1  ;;  %679 = vmatpush3.bf16.msra.mxu1 %v684_v1 }
   0x8   :  { %654 = vmatprep.subr.bf16.mxu0 %v685_v2  ;;  %676 = vmatprep.subr.bf16.mxu1 %v685_v2 }
   0xb   :  { %655 = vmatpush3.bf16.msra.mxu0 %v685_v2  ;;  %680 = vmatpush3.bf16.msra.mxu1 %v685_v2 }
   0xc   :  { %656 = vmatprep.subr.bf16.mxu0 %v686_v4  ;;  %677 = vmatprep.subr.bf16.mxu1 %v686_v4 }
   0xf   :  { %657 = vmatpush3.bf16.msra.mxu0 %v686_v4  ;;  %681 = vmatpush3.bf16.msra.mxu1 %v686_v4 }
  0x12   :  { %659 = vmatmul.mubr.msk.bf16.vlgmr.msra.gmra.mxu0 %vm175_vm0, %v688_v6  ;;  %667 = vmatmul.mubr.msk.bf16.vlgmr.msra.gmra.mxu1 %vm175_vm0, %v692_v7 }
  0x13   :  { %662 = vmatprep.mubr.msk.bf16.mxu0 %vm175_vm0, %v689_v8  ;;  %670 = vmatprep.mubr.msk.bf16.mxu1 %vm175_vm0, %v693_v9 }
  0x1a   :  { %663 = vmatmul.mubr.msk.bf16.gmra.mxu0 %vm175_vm0, %v690_v10  ;;  %671 = vmatmul.mubr.msk.bf16.gmra.mxu1 %vm175_vm0, %v694_v11 }
  0xd2   :  { %v660_v12 = vpop.f32.mrf.mxu0  ;;  %v668_v13 = vpop.f32.mrf.mxu1 }
  0xd3   :  { %v462_v29 = vmul.f32 %v660_v12, %v660_v12  ;;  %v470_v63 = vmul.f32 %v668_v13, %v668_v13 }
  0xd4   :  { %v234_v14 = vpop.f32.mrf.mxu0  ;;  %v266_v15 = vpop.f32.mrf.mxu1 }
  0xd5   :  { %v460_v20 = vmul.f32 %v234_v14, %v234_v14  ;;  %v468_v57 = vmul.f32 %v266_v15, %v266_v15 }
  0xd6   :  { %v661_v16 = vpop.f32.mrf.mxu0  ;;  %v669_v17 = vpop.f32.mrf.mxu1 }
  0xd7   :  { %v599_v18 = vpack.c.bf16 %v661_v16, %v660_v12  ;;  %v619_v19 = vpack.c.bf16 %v669_v17, %v668_v13  ;;  %v463_v34 = vmul.f32 %v661_v16, %v661_v16  ;;  %v471_v2 = vmul.f32 %v669_v17, %v669_v17 }
  0xd8   :  { %v237_v21 = vpop.f32.mrf.mxu0  ;;  %v269_v22 = vpop.f32.mrf.mxu1 }
  0xd9   :  { %631 = vst [vmem:[%s796_s2 + $0x8] sm:$0xff] %v599_v18   ;;  %v594_v23 = vpack.c.bf16 %v237_v21, %v234_v14  ;;  %v436_v24 = vadd.f32 %v237_v21, %v234_v14  ;;  %v461_v25 = vmul.f32 %v237_v21, %v237_v21  ;;  %635 = vst [vmem:[%s796_s2 + $0x28] sm:$0xff] %v619_v19  }
  0xda   :  { %v614_v26 = vpack.c.bf16 %v269_v22, %v266_v15  ;;  %v664_v27 = vpop.f32.mrf.mxu0  ;;  %v672_v28 = vpop.f32.mrf.mxu1  ;;  %v469_v61 = vmul.f32 %v269_v22, %v269_v22 }
  0xdb   :  { %595 = vst [vmem:[%s796_s2] sm:$0xff] %v594_v23   ;;  %v437_v30 = vadd.f32 %v660_v12, %v436_v24  ;;  %v476_v31 = vadd.f32 %v461_v25, %v460_v20  ;;  %v466_v51 = vmul.f32 %v664_v27, %v664_v27  ;;  %v474_v11 = vmul.f32 %v672_v28, %v672_v28 }
  0xdc   :  { %634 = vst [vmem:[%s796_s2 + $0x20] sm:$0xff] %v614_v26   ;;  %v250_v32 = vpop.f32.mrf.mxu0  ;;  %v282_v33 = vpop.f32.mrf.mxu1 }
  0xdd   :  { %v477_v35 = vadd.f32 %v476_v31, %v462_v29  ;;  %v438_v36 = vadd.f32 %v661_v16, %v437_v30  ;;  %v464_v40 = vmul.f32 %v250_v32, %v250_v32  ;;  %v472_v6 = vmul.f32 %v282_v33, %v282_v33 }
  0xde   :  { %v665_v37 = vpop.f32.mrf.mxu0  ;;  %v673_v38 = vpop.f32.mrf.mxu1 }
  0xdf   :  { %v439_v39 = vadd.f32 %v438_v36, %v250_v32  ;;  %v478_v41 = vadd.f32 %v477_v35, %v463_v34  ;;  %v609_v42 = vpack.c.bf16 %v665_v37, %v664_v27  ;;  %v629_v44 = vpack.c.bf16 %v673_v38, %v672_v28 }
  0xe0   :  { %v253_v43 = vpop.f32.mrf.mxu0  ;;  %v285_v45 = vpop.f32.mrf.mxu1  ;;  %v467_v54 = vmul.f32 %v665_v37, %v665_v37  ;;  %v475_v16 = vmul.f32 %v673_v38, %v673_v38 }
  0xe1   :  { %v479_v46 = vadd.f32 %v478_v41, %v464_v40  ;;  %633 = vst [vmem:[%s796_s2 + $0x18] sm:$0xff] %v609_v42   ;;  %v604_v47 = vpack.c.bf16 %v253_v43, %v250_v32  ;;  %v440_v48 = vadd.f32 %v439_v39, %v253_v43  ;;  %v465_v49 = vmul.f32 %v253_v43, %v253_v43 }
  0xe2   :  { %637 = vst [vmem:[%s796_s2 + $0x38] sm:$0xff] %v629_v44   ;;  %v624_v50 = vpack.c.bf16 %v285_v45, %v282_v33  ;;  %v473_v10 = vmul.f32 %v285_v45, %v285_v45 }
  0xe3   :  { %632 = vst [vmem:[%s796_s2 + $0x10] sm:$0xff] %v604_v47   ;;  %v441_v52 = vadd.f32 %v664_v27, %v440_v48  ;;  %v480_v53 = vadd.f32 %v479_v46, %v465_v49 }
  0xe4   :  { %636 = vst [vmem:[%s796_s2 + $0x30] sm:$0xff] %v624_v50  }
  0xe5   :  { %v442_v55 = vadd.f32 %v665_v37, %v441_v52  ;;  %v481_v56 = vadd.f32 %v480_v53, %v466_v51 }
  0xe7   :  { %v482_v58 = vadd.f32 %v481_v56, %v467_v54  ;;  %v443_v59 = vadd.f32 %v442_v55, %v266_v15 }
  0xe9   :  { %v444_v60 = vadd.f32 %v443_v59, %v269_v22  ;;  %v483_v62 = vadd.f32 %v482_v58, %v468_v57 }
  0xeb   :  { %v445_v0 = vadd.f32 %v668_v13, %v444_v60  ;;  %v484_v1 = vadd.f32 %v483_v62, %v469_v61 }
  0xed   :  { %v485_v3 = vadd.f32 %v484_v1, %v470_v63  ;;  %v446_v4 = vadd.f32 %v669_v17, %v445_v0 }
  0xef   :  { %v447_v5 = vadd.f32 %v446_v4, %v282_v33  ;;  %v486_v7 = vadd.f32 %v485_v3, %v471_v2 }
  0xf1   :  { %v487_v8 = vadd.f32 %v486_v7, %v472_v6  ;;  %v448_v9 = vadd.f32 %v447_v5, %v285_v45 }
  0xf3   :  { %v449_v12 = vadd.f32 %v672_v28, %v448_v9  ;;  %v488_v14 = vadd.f32 %v487_v8, %v473_v10 }
  0xf5   :  { %v450_v15 = vadd.f32 %v673_v38, %v449_v12  ;;  %v489_v18 = vadd.f32 %v488_v14, %v474_v11 }
  0xf7   :  { %v451_v19 = vrot.slane %v450_v15, 4  ;;  %v490_v20 = vadd.f32 %v489_v18, %v475_v16 }
  0xf9   :  { %v452_v21 = vadd.f32 %v451_v19, %v450_v15  ;;  %v491_v13 = vrot.slane %v490_v20, 4 }
  0xfb   :  { %v453_v22 = vrot.slane %v452_v21, 2  ;;  %v492_v23 = vadd.f32 %v491_v13, %v490_v20 }
  0xfd   :  { %v454_v24 = vadd.f32 %v453_v22, %v452_v21  ;;  %v493_v17 = vrot.slane %v492_v23, 2 }
  0xff   :  { %v455_v25 = vrot.slane %v454_v24, 1  ;;  %v494_v26 = vadd.f32 %v493_v17, %v492_v23 }
 0x101   :  { %v456_v27 = vadd.f32 %v455_v25, %v454_v24  ;;  %v495_v29 = vrot.slane %v494_v26, 1 }
 0x103   :  { %v496_v30 = vadd.f32 %v495_v29, %v494_v26  ;;  %458 = vst [vmem:[%s797_s3] sm:$0xff] %v456_v27 }
 0x105   :  { %498 = vst [vmem:[%s798_s4] sm:$0xff] %v496_v30 }

</bundles_post_ra>
